<compile_context>
chip_gen: v7x
topology: tpu7x:2x2x1
jax: 0.10.0
libtpu: 0.0.40
codegen_flags: <defaults>
</compile_context>

<pallas_src>
import jax
import jax.numpy as jnp
from jax.experimental import pallas as pl
from jax.experimental.pallas import tpu as pltpu

DIM = 256          # hidden dim (hardcoded in the PyTorch module)
LAYER_NUM = 4
LSTM_HIDDEN = 256
VMEM_LIMIT = 48 * 1024 * 1024   # explicit budget: fits v5e/v6e/v7x scoped VMEM


def _row_tile(n):
    # Largest row tile (multiple of 8, <=256) that divides N; fall back to N.
    for tm in (256, 128, 64, 32, 16, 8):
        if n % tm == 0:
            return tm
    return n


def _cparams():
    return pltpu.CompilerParams(
        dimension_semantics=("parallel", "arbitrary"),   # row tiles parallel (v7x megacore)
        vmem_limit_bytes=VMEM_LIMIT)


# ---------------- Stage 1: lin1 + per-layer xw = lin1(x) @ W_gat^T ----------------
def _lin1_xw_kernel(xin_ref, w1t_ref, b1_ref, wgt_ref, x0_ref, xw_ref):
    # lin1 recomputed per layer step (Din << DIM so it is cheap); written once at l==0.
    x = (jnp.dot(xin_ref[...], w1t_ref[...], preferred_element_type=jnp.float32)
         + b1_ref[...])                                                   # [TM, D] f32

    @pl.when(pl.program_id(1) == 0)
    def _():
        x0_ref[...] = x

    xw_ref[0] = jnp.dot(x.astype(jnp.bfloat16), wgt_ref[0],
                        preferred_element_type=jnp.float32)               # [TM, D] f32


# ---------------- Stage 2: Breadth = tanh(GATConv(x)) for 4 layers ----------------
def _gat_kernel(xwf_ref, xwt_ref, asrc_ref, adst_ref, gb_ref, adj_ref, o_ref):
    xw_full = xwf_ref[0]                                                  # [N,  D] f32
    xw_tile = xwt_ref[0]                                                  # [TM, D] f32
    a_dst = jnp.sum(xw_tile * adst_ref[0], axis=-1, keepdims=True)        # [TM, 1]
    a_src = jnp.einsum('md,nd->mn', asrc_ref[0], xw_full,
                       preferred_element_type=jnp.float32)                # [1, N]
    e = a_dst + a_src                              # e[i, j] = a_dst[i] + a_src[j]
    e = jnp.where(e > 0, e, 0.2 * e)               # leaky_relu(negative_slope=0.2)
    e = jnp.where(adj_ref[...] > 0, e, jnp.float32(-1e30))   # mask non-edges
    m = jnp.max(e, axis=-1, keepdims=True)
    p = jnp.exp(e - m)                             # masked entries underflow to exactly 0
    inv = pl.reciprocal(jnp.sum(p, axis=-1, keepdims=True), approx=True)  # [TM, 1]
    agg = jnp.dot(p.astype(jnp.bfloat16), xw_full.astype(jnp.bfloat16),
                  preferred_element_type=jnp.float32)                     # [TM, D]
    o_ref[0] = jnp.tanh(agg * inv + gb_ref[0]).astype(o_ref.dtype)


# --------- Stage 3: 4 fused LSTM-cell depth steps (bias=False) + lin2 ---------
def _depth_lin2_kernel(ht_ref, x0_ref, wih_h_ref, wih_x_ref, whh_ref,
                       w2_ref, b2_ref, o_ref, h_sc, c_sc, x_sc):
    l = pl.program_id(1)
    H = h_sc.shape[1]

    @pl.when(l == 0)
    def _():
        h_sc[...] = jnp.zeros_like(h_sc)
        c_sc[...] = jnp.zeros_like(c_sc)
        x_sc[...] = x0_ref[...]

    gates = (
        jnp.dot(ht_ref[0], wih_h_ref[0], preferred_element_type=jnp.float32)
        + jnp.dot(x_sc[...].astype(jnp.bfloat16), wih_x_ref[0],
                  preferred_element_type=jnp.float32)
        + jnp.dot(h_sc[...].astype(jnp.bfloat16), whh_ref[0],
                  preferred_element_type=jnp.float32))                    # [TM, 4H]
    i_g = jax.nn.sigmoid(gates[:, 0:H])            # PyTorch gate order: i, f, g, o
    f_g = jax.nn.sigmoid(gates[:, H:2 * H])
    g_g = jnp.tanh(gates[:, 2 * H:3 * H])
    o_g = jax.nn.sigmoid(gates[:, 3 * H:4 * H])
    c_new = f_g * c_sc[...] + i_g * g_g
    h_new = o_g * jnp.tanh(c_new)
    c_sc[...] = c_new
    h_sc[...] = h_new
    x_sc[...] = h_new                              # seq_len=1: LSTM output == new hidden

    @pl.when(l == pl.num_programs(1) - 1)
    def _():
        # fused lin2, padded to a 128-wide lane-dense output slab
        o_ref[...] = (jnp.dot(h_new.astype(jnp.bfloat16), w2_ref[...],
                              preferred_element_type=jnp.float32)
                      + b2_ref[...])


# ------------------------------- Full forward -------------------------------
def genie_path_lazy_forward(params, x_in, adj):
    N, din = x_in.shape
    out_dim = params['lin2_w'].shape[0]
    TM = _row_tile(N)
    nrt = N // TM
    p_out = ((out_dim + 127) // 128) * 128         # lane-dense padded output width

    f32, bf16 = jnp.float32, jnp.bfloat16
    x_bf = x_in.astype(bf16)
    adj_bf = adj.astype(bf16)

    w1t = params['lin1_w'].T.astype(bf16)                                 # [din, D]
    b1 = params['lin1_b'].reshape(1, -1).astype(f32)
    wgt_all = jnp.stack([w.T for w in params['gat_w']]).astype(bf16)      # [L, D, D]
    asrc_all = jnp.stack(list(params['gat_att_src'])).astype(f32)         # [L, 1, D]
    adst_all = jnp.stack(list(params['gat_att_dst'])).astype(f32)         # [L, 1, D]
    gb_all = jnp.stack([b.reshape(1, -1) for b in params['gat_b']]).astype(f32)

    wih_t = [w.T for w in params['lstm_w_ih']]                            # [2D, 4H]
    wih_h_all = jnp.stack([w[:DIM] for w in wih_t]).astype(bf16)          # [L, D, 4H]
    wih_x_all = jnp.stack([w[DIM:] for w in wih_t]).astype(bf16)          # [L, D, 4H]
    whh_all = jnp.stack([w.T for w in params['lstm_w_hh']]).astype(bf16)  # [L, H, 4H]

    w2_pad = (jnp.zeros((DIM, p_out), f32)
              .at[:, :out_dim].set(params['lin2_w'].T)).astype(bf16)
    b2_pad = jnp.zeros((1, p_out), f32).at[:, :out_dim].set(
        params['lin2_b'].reshape(1, -1))

    # --- Stage 1: lin1 + xw for all 4 GAT layers (x-tile resident across layers) ---
    x0, xw_all = pl.pallas_call(
        _lin1_xw_kernel,
        out_shape=(jax.ShapeDtypeStruct((N, DIM), f32),
                   jax.ShapeDtypeStruct((LAYER_NUM, N, DIM), f32)),
        grid_spec=pltpu.PrefetchScalarGridSpec(
            num_scalar_prefetch=0,
            grid=(nrt, LAYER_NUM),
            in_specs=[
                pl.BlockSpec((TM, din), lambda r, l: (r, 0)),
                pl.BlockSpec((din, DIM), lambda r, l: (0, 0)),
                pl.BlockSpec((1, DIM), lambda r, l: (0, 0)),
                pl.BlockSpec((1, DIM, DIM), lambda r, l: (l, 0, 0)),
            ],
            out_specs=(
                pl.BlockSpec((TM, DIM), lambda r, l: (r, 0)),
                pl.BlockSpec((1, TM, DIM), lambda r, l: (l, r, 0)),
            )),
        compiler_params=_cparams(),
    )(x_bf, w1t, b1, wgt_all)

    # --- Stage 2: 4 breadth (GAT) layers; adj row-tile resident across layer axis ---
    h_tmps = pl.pallas_call(
        _gat_kernel,
        out_shape=jax.ShapeDtypeStruct((LAYER_NUM, N, DIM), bf16),
        grid_spec=pltpu.PrefetchScalarGridSpec(
            num_scalar_prefetch=0,
            grid=(nrt, LAYER_NUM),
            in_specs=[
                pl.BlockSpec((1, N, DIM), lambda r, l: (l, 0, 0)),    # full xw (sources)
                pl.BlockSpec((1, TM, DIM), lambda r, l: (l, r, 0)),   # xw for target rows
                pl.BlockSpec((1, 1, DIM), lambda r, l: (l, 0, 0)),    # att_src
                pl.BlockSpec((1, 1, DIM), lambda r, l: (l, 0, 0)),    # att_dst
                pl.BlockSpec((1, 1, DIM), lambda r, l: (l, 0, 0)),    # gat bias
                pl.BlockSpec((TM, N), lambda r, l: (r, 0)),           # adj (resident over l)
            ],
            out_specs=pl.BlockSpec((1, TM, DIM), lambda r, l: (l, r, 0))),
        compiler_params=_cparams(),
    )(xw_all, xw_all, asrc_all, adst_all, gb_all, adj_bf)

    # --- Stage 3: 4 depth LSTM steps + lin2; h/c/x carried in VMEM scratch ---
    out_pad = pl.pallas_call(
        _depth_lin2_kernel,
        out_shape=jax.ShapeDtypeStruct((N, p_out), f32),
        grid_spec=pltpu.PrefetchScalarGridSpec(
            num_scalar_prefetch=0,
            grid=(nrt, LAYER_NUM),
            in_specs=[
                pl.BlockSpec((1, TM, DIM), lambda r, l: (l, r, 0)),                 # h_tmp
                pl.BlockSpec((TM, DIM), lambda r, l: (r, 0)),                       # x0
                pl.BlockSpec((1, DIM, 4 * LSTM_HIDDEN), lambda r, l: (l, 0, 0)),    # w_ih (h_tmp part)
                pl.BlockSpec((1, DIM, 4 * LSTM_HIDDEN), lambda r, l: (l, 0, 0)),    # w_ih (x part)
                pl.BlockSpec((1, LSTM_HIDDEN, 4 * LSTM_HIDDEN), lambda r, l: (l, 0, 0)),
                pl.BlockSpec((DIM, p_out), lambda r, l: (0, 0)),                    # lin2 W (padded)
                pl.BlockSpec((1, p_out), lambda r, l: (0, 0)),                      # lin2 b (padded)
            ],
            out_specs=pl.BlockSpec((TM, p_out), lambda r, l: (r, 0)),
            scratch_shapes=[pltpu.VMEM((TM, LSTM_HIDDEN), f32),   # h
                            pltpu.VMEM((TM, LSTM_HIDDEN), f32),   # c
                            pltpu.VMEM((TM, DIM), f32)]),         # x
        compiler_params=_cparams(),
    )(h_tmps, x0, wih_h_all, wih_x_all, whh_all, w2_pad, b2_pad)

    return out_pad[:, :out_dim]


# --------------------------- plain-JAX reference ---------------------------
def reference_forward(params, x, adj):
    def lin(x, w, b):
        return x @ w.T + b
    x = lin(x, params['lin1_w'], params['lin1_b'])
    N = x.shape[0]
    h = jnp.zeros((N, LSTM_HIDDEN), jnp.float32)
    c = jnp.zeros((N, LSTM_HIDDEN), jnp.float32)
    h_tmps = []
    for i in range(LAYER_NUM):
        xw = x @ params['gat_w'][i].T
        a_dst = jnp.sum(xw * params['gat_att_dst'][i], -1, keepdims=True)
        a_src = jnp.sum(xw * params['gat_att_src'][i], -1)[None, :]
        e = a_dst + a_src
        e = jnp.where(e > 0, e, 0.2 * e)
        e = jnp.where(adj > 0, e, -1e30)
        p = jnp.exp(e - e.max(-1, keepdims=True))
        p = jnp.where(adj > 0, p, 0.0)
        alpha = p / p.sum(-1, keepdims=True)
        h_tmps.append(jnp.tanh(alpha @ xw + params['gat_b'][i]))
    H = LSTM_HIDDEN
    for i in range(LAYER_NUM):
        inp = jnp.concatenate([h_tmps[i], x], -1)
        gates = inp @ params['lstm_w_ih'][i].T + h @ params['lstm_w_hh'][i].T
        ii = jax.nn.sigmoid(gates[:, :H])
        f = jax.nn.sigmoid(gates[:, H:2 * H])
        g = jnp.tanh(gates[:, 2 * H:3 * H])
        o = jax.nn.sigmoid(gates[:, 3 * H:4 * H])
        c = f * c + ii * g
        h = o * jnp.tanh(c)
        x = h
    return lin(x, params['lin2_w'], params['lin2_b'])


if __name__ == "__main__":
    N, IN_DIM, OUT_DIM = 16, 32, 8

    key = jax.random.PRNGKey(0)
    ks = list(jax.random.split(key, 64))
    s = 0.05

    def nrm(k, shape):
        return (s * jax.random.normal(k, shape)).astype(jnp.float32)

    params = {
        'lin1_w': nrm(ks[0], (DIM, IN_DIM)),
        'lin1_b': nrm(ks[1], (DIM,)),
        'lin2_w': nrm(ks[2], (OUT_DIM, DIM)),
        'lin2_b': nrm(ks[3], (OUT_DIM,)),
        'gat_w': [nrm(ks[4 + i], (DIM, DIM)) for i in range(LAYER_NUM)],
        'gat_att_src': [nrm(ks[8 + i], (1, DIM)) for i in range(LAYER_NUM)],
        'gat_att_dst': [nrm(ks[12 + i], (1, DIM)) for i in range(LAYER_NUM)],
        'gat_b': [nrm(ks[16 + i], (DIM,)) for i in range(LAYER_NUM)],
        'lstm_w_ih': [nrm(ks[20 + i], (4 * LSTM_HIDDEN, 2 * DIM)) for i in range(LAYER_NUM)],
        'lstm_w_hh': [nrm(ks[24 + i], (4 * LSTM_HIDDEN, LSTM_HIDDEN)) for i in range(LAYER_NUM)],
    }

    # deterministic node features and edge_index (no duplicate edges, no self loops)
    x = jax.random.normal(ks[40], (N, IN_DIM)).astype(jnp.float32)
    src = jnp.concatenate([jnp.arange(N), jnp.arange(N)])
    dst = jnp.concatenate([(jnp.arange(N) + 1) % N, (jnp.arange(N) + 5) % N])
    edge_index = jnp.stack([src, dst]).astype(jnp.int32)        # [2, E], E = 32

    # densify: adj[target, source] = 1, plus self loops (GATConv add_self_loops=True)
    adj = jnp.zeros((N, N), jnp.float32).at[edge_index[1], edge_index[0]].set(1.0)
    adj = jnp.maximum(adj, jnp.eye(N, dtype=jnp.float32))

    out = genie_path_lazy_forward(params, x, adj)
    out = jax.block_until_ready(out)

    ref = reference_forward(params, x, adj)
    assert out.shape == (N, OUT_DIM)
    assert jnp.allclose(out, ref, atol=2e-2, rtol=2e-2), "mismatch vs reference"

    print("KERNEL_OK")
</pallas_src>

<mosaic_0001>
module attributes {stable_mosaic.version = 11 : i64} {
  func.func @_lin1_xw_kernel(%arg0: i32, %arg1: i32, %arg2: memref<16x32xbf16, #tpu.memory_space<vmem>>, %arg3: memref<32x256xbf16, #tpu.memory_space<vmem>>, %arg4: memref<1x256xf32, #tpu.memory_space<vmem>>, %arg5: memref<1x256x256xbf16, #tpu.memory_space<vmem>>, %arg6: memref<16x256xf32, #tpu.memory_space<vmem>>, %arg7: memref<1x16x256xf32, #tpu.memory_space<vmem>>) attributes {dimension_semantics = [#tpu.dimension_semantics<parallel>, #tpu.dimension_semantics<arbitrary>], iteration_bounds = array<i64: 1, 4>, scalar_prefetch = 0 : i64, scratch_operands = 0 : i64, tpu.core_type = #tpu.core_type<tc>, window_params = [{transform_indices = @transform_0, window_bounds = array<i64: 16, 32>}, {pipeline_mode = #tpu.pipeline_mode<synchronous>, transform_indices = @transform_1, window_bounds = array<i64: 32, 256>}, {pipeline_mode = #tpu.pipeline_mode<synchronous>, transform_indices = @transform_2, window_bounds = array<i64: 1, 256>}, {transform_indices = @transform_3, window_bounds = array<i64: 1, 256, 256>}, {transform_indices = @transform_4, window_bounds = array<i64: 16, 256>}, {transform_indices = @transform_5, window_bounds = array<i64: 1, 16, 256>}]} {
    %c0 = arith.constant 0 : index
    %c0_0 = arith.constant 0 : index
    %0 = vector.load %arg2[%c0, %c0_0] : memref<16x32xbf16, #tpu.memory_space<vmem>>, vector<16x32xbf16>
    %c0_1 = arith.constant 0 : index
    %c0_2 = arith.constant 0 : index
    %1 = vector.load %arg3[%c0_1, %c0_2] : memref<32x256xbf16, #tpu.memory_space<vmem>>, vector<32x256xbf16>
    %cst = arith.constant dense<0.000000e+00> : vector<16x256xf32>
    %2 = tpu.matmul %0, %1, %cst {dimension_numbers = #tpu.dot_dimension_numbers<[1], [0], [0], [1], [0, 0, 1, 1], [], []>} : vector<16x32xbf16>, vector<32x256xbf16>, vector<16x256xf32> -> vector<16x256xf32>
    %c0_3 = arith.constant 0 : index
    %c0_4 = arith.constant 0 : index
    %3 = vector.load %arg4[%c0_3, %c0_4] : memref<1x256xf32, #tpu.memory_space<vmem>>, vector<1x256xf32>
    %4 = vector.broadcast %3 : vector<1x256xf32> to vector<16x256xf32>
    %5 = arith.addf %2, %4 : vector<16x256xf32>
    %c0_i32 = arith.constant 0 : i32
    %6 = arith.cmpi eq, %arg1, %c0_i32 : i32
    %7 = arith.extui %6 : i1 to i32
    %c0_i32_5 = arith.constant 0 : i32
    %8 = arith.cmpi ne, %7, %c0_i32_5 : i32
    scf.if %8 {
      %c0_13 = arith.constant 0 : index
      %c0_14 = arith.constant 0 : index
      %16 = vector.load %arg6[%c0_13, %c0_14] : memref<16x256xf32, #tpu.memory_space<vmem>>, vector<16x256xf32>
      tpu.vector_store %arg6[%c0_13, %c0_14], %5 {strides = array<i32>} : memref<16x256xf32, #tpu.memory_space<vmem>>, vector<16x256xf32>,
    } else {
    }
    %9 = arith.truncf %5 : vector<16x256xf32> to vector<16x256xbf16>
    %c0_6 = arith.constant 0 : index
    %c0_7 = arith.constant 0 : index
    %c0_8 = arith.constant 0 : index
    %10 = vector.load %arg5[%c0_6, %c0_7, %c0_8] : memref<1x256x256xbf16, #tpu.memory_space<vmem>>, vector<1x256x256xbf16>
    %11 = vector.shape_cast %10 : vector<1x256x256xbf16> to vector<256x256xbf16>
    %cst_9 = arith.constant dense<0.000000e+00> : vector<16x256xf32>
    %12 = tpu.matmul %9, %11, %cst_9 {dimension_numbers = #tpu.dot_dimension_numbers<[1], [0], [0], [1], [0, 0, 1, 1], [], []>} : vector<16x256xbf16>, vector<256x256xbf16>, vector<16x256xf32> -> vector<16x256xf32>
    %c0_10 = arith.constant 0 : index
    %c0_11 = arith.constant 0 : index
    %c0_12 = arith.constant 0 : index
    %13 = vector.load %arg7[%c0_10, %c0_11, %c0_12] : memref<1x16x256xf32, #tpu.memory_space<vmem>>, vector<1x16x256xf32>
    %14 = vector.shape_cast %13 : vector<1x16x256xf32> to vector<16x256xf32>
    %15 = vector.shape_cast %12 : vector<16x256xf32> to vector<1x16x256xf32>
    tpu.vector_store %arg7[%c0_10, %c0_11, %c0_12], %15 {strides = array<i32>} : memref<1x16x256xf32, #tpu.memory_space<vmem>>, vector<1x16x256xf32>,
    return
  }
  func.func @transform_0(%arg0: i32, %arg1: i32) -> (i32, i32) {
    %c0_i32 = arith.constant 0 : i32
    %c0_i32_0 = arith.constant 0 : i32
    return %arg0, %c0_i32 : i32, i32
  }
  func.func @transform_1(%arg0: i32, %arg1: i32) -> (i32, i32) {
    %c0_i32 = arith.constant 0 : i32
    %c0_i32_0 = arith.constant 0 : i32
    %c0_i32_1 = arith.constant 0 : i32
    return %c0_i32, %c0_i32_0 : i32, i32
  }
  func.func @transform_2(%arg0: i32, %arg1: i32) -> (i32, i32) {
    %c0_i32 = arith.constant 0 : i32
    %c0_i32_0 = arith.constant 0 : i32
    %c0_i32_1 = arith.constant 0 : i32
    return %c0_i32, %c0_i32_0 : i32, i32
  }
  func.func @transform_3(%arg0: i32, %arg1: i32) -> (i32, i32, i32) {
    %c0_i32 = arith.constant 0 : i32
    %c0_i32_0 = arith.constant 0 : i32
    %c0_i32_1 = arith.constant 0 : i32
    return %arg1, %c0_i32, %c0_i32_0 : i32, i32, i32
  }
  func.func @transform_4(%arg0: i32, %arg1: i32) -> (i32, i32) {
    %c0_i32 = arith.constant 0 : i32
    %c0_i32_0 = arith.constant 0 : i32
    return %arg0, %c0_i32 : i32, i32
  }
  func.func @transform_5(%arg0: i32, %arg1: i32) -> (i32, i32, i32) {
    %c0_i32 = arith.constant 0 : i32
    %c0_i32_0 = arith.constant 0 : i32
    return %arg1, %arg0, %c0_i32 : i32, i32, i32
  }
}

</mosaic_0001>

<bundles_post_ra>
// kernel: tpu_custom_call.1
= control target key start
LH: loop header
LB: loop body
LE: loop exit
PB: predicated region body
PF: predicated region fallthrough
CT: control target
= control target key end

     0   :  { %11 = vsyncpa [#allocation3], 0  ;;  %s1603_s0 = inlined_call_operand.hbm [shape: bf16[16,32], index: 0, kind: input, shape index: {}]   ;;  %s1604_s1 = inlined_call_operand.hbm [shape: bf16[32,256], index: 1, kind: input, shape index: {}]   ;;  %s1605_s2 = inlined_call_operand.vmem [shape: f32[1,256], index: 2, kind: input, shape index: {}]   ;;  %s1606_s3 = inlined_call_operand.hbm [shape: bf16[4,256,256], index: 3, kind: input, shape index: {}]   ;;  %s1607_s4 = inlined_call_operand.hbm [shape: f32[16,256], index: 4, kind: output, shape index: {0}]   ;;  %s1608_s5 = inlined_call_operand.hbm [shape: f32[4,16,256], index: 5, kind: output, shape index: {1}]  }
   0x1   :  { %12 = vsyncpa [#allocation6], 0 }
   0x2   :  { %13 = vsyncpa [#allocation4], 0 }
   0x3   :  { %14 = vsyncpa [#allocation10], 0 }
   0x4   :  { %16 = vsyncpa [#allocation10 + $0x1], 0  ;;  %s1257_s18 = smov 0   ;;  %s1259_s19 = smov 0  }
   0x5   :  { %s1261_s20 = smov 0   ;;  %s1263_s21 = smov 0  }
   0x6   :  { %s1265_s22 = smov 0   ;;  %s1267_s23 = smov 0  }
   0x7 LB: > { %s1288_s24 = sadd.s32 4294967295, %s1213_s23   ;;  %s794_s25 = sadd.s32 4294967294, %s1213_s23   ;;  %s1213_s23 = sphi %s1267_s23, %s22_s23   ;;  %s1209_s22 = sphi %s1265_s22, %s1643_s22   ;;  %s1205_s21 = sphi %s1263_s21, %s1642_s21   ;;  %s1201_s20 = sphi %s1261_s20, %s1641_s20   ;;  %s1197_s19 = sphi %s1259_s19, %s1640_s19   ;;  %s1193_s18 = sphi %s1257_s18, %s1639_s18  }
   0x8   : > { %p116_p0 = scmp.ne.s32.totalorder %s1201_s20, %s1197_s19  ;;  %p117_p1 = scmp.eq.s32.totalorder %s1213_s23, 0 }
   0x9   : > { %p122_p2 = scmp.ne.s32.totalorder %s1197_s19, %s1193_s18  ;;  %p1610_p3 = scmp.eq.s32.totalorder %s1288_s24, 0 }
   0xa   : > { %p1297_p4 = por %p117_p1, %p116_p0  ;;  %p1609_p5 = scmp.eq.s32.totalorder %s1288_s24, 3 }
   0xb   : > { %p1304_p6 = por %p1610_p3, %p122_p2  ;;  %p180_p7 = scmp.eq.s32.totalorder %s794_s25, 3 }
   0xc   : > { %p1310_p8 = por %p1609_p5, %p116_p0  ;;  %p795_p9 = scmp.ge.s32.totalorder %s1213_s23, 1 }
   0xd   : > { %s1617_s27 = scalar_select %p1304_p6, 1, 0 }
   0xe   : > { %s1618_s28 = scalar_select %p1310_p8, 1, 0 }
   0xf   : > { %p1315_p10 = por %p180_p7, %p122_p2  ;;  %p187_p11 = scmp.lt.s32.totalorder %s1213_s23, 5 }
  0x10   : > { %s1215_s6 = smov [#allocation2]   ;;  %p888_p0 = scmp.lt.s32.totalorder %s1213_s23, 4 }
  0x11   : > { %s1619_s29 = scalar_select %p1315_p10, 1, 0 }
  0x12   : > { %p1320_p12 = pnand %p795_p9, %p187_p11  ;;  %s202_s7 = sshll.u32 %s1215_s6, 4  ;;  %s1324_s7 = int_to_ptr.vmem [resolvable:$true] %s202_s7 }
  0x13   : > { %1620 = sst [smem:[#allocation16_spill]] %s1619_s29  ;;  %p1337_p2 = pnand %p888_p0, %p1297_p4 }
  0x14   : > { %p871_p13 = pneg %p1320_p12  ;;  %s1216_s10 = smov [#allocation5]  }
  0x15   : > { %s215_s11 = sshll.u32 %s1216_s10, 4  ;;  %s1007_s14 = scalar_lea.hbm %s1603_s0, 128  ;;  %s1341_s11 = int_to_ptr.vmem [resolvable:$true] %s215_s11 }
  0x16   : > { %p1331_p1 = pnand %p871_p13, %p1610_p3  ;;  %p1008_p7 = scmp.ne.s32.totalorder %s1603_s0, %s1007_s14 }
  0x17   : > { %p1014_p13 = scmp.lt.u32.totalorder %s1007_s14, %s1603_s0 }
  0x18   : > { %p1009_p9 = pneg %p1331_p1 }
  0x1a   : > { %p1010_p4 = pnand %p1009_p9, %p1008_p7 }
  0x1c   : > { %p1011_p11 = pneg %p1010_p4 }
  0x1e   : > { %p1016_p0 = pnand %p1014_p13, %p1011_p11 }
  0x20   : > { %1019 = shalt.err (!%p1016_p0)
}
  0x21   : > { %s1020_s26 = scalar_lea.vmem %s1324_s7, 128  ;;  %p1028_p8 = scmp.lt.s32.totalorder %s1324_s7, %s1324_s7 }
  0x22   : > { %p1021_p5 = scmp.ne.s32.totalorder %s1324_s7, %s1020_s26  ;;  %p1029_p7 = scmp.lt.s32.totalorder %s1020_s26, %s1020_s26 }
  0x24   : > { %p1023_p3 = pnand %p1021_p5, %p1009_p9  ;;  %p1030_p4 = por %p1029_p7, %p1028_p8 }
  0x26   : > { %p1024_p10 = pneg %p1023_p3 }
  0x28   : > { %p1031_p6 = pnand %p1030_p4, %p1024_p10 }
  0x2a   : > { %1034 = shalt.err (!%p1031_p6)
}
  0x2b   : > { %s1217_s6 = smov 64   ;;  %s1218_s10 = smov 4  }
  0x2c   : > { %874 = dma.hbm_to_vmem [thread:$0]  (!%p1331_p1), %s1603_s0, 128, %s1324_s7, [#allocation3], %s1217_s6, %s1217_s6, %s1218_s10  }
  0x2d   : > { %s1035_s16 = scalar_lea.hbm %s1604_s1, 512 }
  0x2e   : > { %p1036_p3 = scmp.ne.s32.totalorder %s1604_s1, %s1035_s16  ;;  %p1042_p8 = scmp.lt.u32.totalorder %s1035_s16, %s1604_s1 }
  0x30   : > { %p1038_p5 = pnand %p1036_p3, %p1009_p9 }
  0x32   : > { %p1039_p6 = pneg %p1038_p5 }
  0x34   : > { %p1044_p10 = pnand %p1042_p8, %p1039_p6 }
  0x36   : > { %1047 = shalt.err (!%p1044_p10)
}
  0x37   : > { %s1048_s7 = scalar_lea.vmem %s1341_s11, 512  ;;  %p1056_p7 = scmp.lt.s32.totalorder %s1341_s11, %s1341_s11 }
  0x38   : > { %p1049_p11 = scmp.ne.s32.totalorder %s1341_s11, %s1048_s7  ;;  %p1057_p4 = scmp.lt.s32.totalorder %s1048_s7, %s1048_s7 }
  0x3a   : > { %p1051_p13 = pnand %p1049_p11, %p1009_p9  ;;  %p1058_p3 = por %p1057_p4, %p1056_p7 }
  0x3c   : > { %p1052_p0 = pneg %p1051_p13 }
  0x3e   : > { %p1059_p5 = pnand %p1058_p3, %p1052_p0 }
  0x40   : > { %1062 = shalt.err (!%p1059_p5)
}
  0x41   : > { %s1614_s29 = smov 128   ;;  %s1615_s6 = smov 8  }
  0x42   : > { %877 = dma.hbm_to_vmem [thread:$0]  (!%p1331_p1), %s1604_s1, 512, %s1341_s11, [#allocation6], %s1614_s29, %s1614_s29, %s1615_s6  }
  0x43   : > { %s109_s13 = sadd.s32 1, %s1201_s20  ;;  %s31_s14 = sadd.s32 1, %s1209_s22 }
  0x44   : > { %s232_s15 = sand.u32 1, %s1213_s23   ;;  %p32_p9 = scmp.ge.s32.totalorder %s31_s14, 4 }
  0x45   : > { %s234_s16 = sand.u32 1, %s1201_s20   ;;  %s853_s17 = sshll.u32 %s1209_s22, 12 }
  0x46   : > { %s1645_s14 = smov (%p32_p9, %s31_s14), 0  ;;  %s799_s8 = sshll.u32 %s234_s16, 8 }
  0x47   : > { %s1408_s7 = scalar_lea.hbm %s1606_s3, %s853_s17  ;;  %s106_s11 = ssub.s32 %s1209_s22, %s1645_s14 }
  0x48   : > { %p107_p1 = scmp.eq.s32.totalorder %s106_s11, 0  ;;  %s236_s10 = scalar_lea.vmem [#allocation7], %s799_s8 }
  0x49   : > { %s243_s12 = sshll.u32 %s236_s10, 4  ;;  %s1417_s6 = scalar_lea.sflag [#allocation3], %s232_s15  ;;  %s1412_s12 = int_to_ptr.vmem [resolvable:$true] %s243_s12 }
  0x4a   : > { %s1415_s29 = scalar_select %p107_p1, %s1201_s20, %s109_s13  }
  0x4b   : > { %s1063_s16 = scalar_lea.hbm %s1408_s7, 4096  ;;  %p1065_p8 = pneg %p1337_p2 }
  0x4c   : > { %p1064_p6 = scmp.ne.s32.totalorder %s1408_s7, %s1063_s16  ;;  %s1068_s26 = scalar_lea.hbm %s1606_s3, 16384 }
  0x4d   : > { %p1069_p13 = scmp.lt.u32.totalorder %s1408_s7, %s1606_s3  ;;  %p1070_p0 = scmp.lt.u32.totalorder %s1068_s26, %s1063_s16 }
  0x4e   : > { %p1066_p10 = pnand %p1065_p8, %p1064_p6  ;;  %p1072_p4 = scmp.lt.u32.totalorder %s1063_s16, %s1408_s7 }
  0x4f   : > { %p1071_p7 = por %p1070_p0, %p1069_p13 }
  0x50   : > { %p1067_p11 = pneg %p1066_p10 }
  0x51   : > { %p1073_p3 = por %p1072_p4, %p1071_p7 }
  0x53   : > { %p1074_p5 = pnand %p1073_p3, %p1067_p11 }
  0x55   : > { %1077 = shalt.err (!%p1074_p5)
}
  0x56   : > { %s1078_s13 = scalar_lea.vmem %s1412_s12, 4096  ;;  %s1221_s15 = smov [#allocation7]  }
  0x57   : > { %p1079_p9 = scmp.ne.s32.totalorder %s1412_s12, %s1078_s13  ;;  %s1083_s10 = sshll.u32 %s1221_s15, 4  ;;  %s1084_s10 = int_to_ptr.vmem [resolvable:$false] %s1083_s10 }
  0x58   : > { %s1085_s17 = scalar_lea.vmem %s1084_s10, 8192  ;;  %p1086_p10 = scmp.lt.s32.totalorder %s1412_s12, %s1084_s10 }
  0x59   : > { %p1081_p1 = pnand %p1079_p9, %p1065_p8  ;;  %p1087_p13 = scmp.lt.s32.totalorder %s1085_s17, %s1078_s13 }
  0x5b   : > { %p1082_p6 = pneg %p1081_p1  ;;  %p1088_p0 = por %p1087_p13, %p1086_p10 }
  0x5d   : > { %p1089_p7 = pnand %p1088_p0, %p1082_p6 }
  0x5f   : > { %1092 = shalt.err (!%p1089_p7)
}
  0x60   : > { %s1624_s16 = smov 8   ;;  %s1625_s25 = smov 128  }
  0x61   : > { %881 = dma.hbm_to_vmem [thread:$0]  (!%p1337_p2), %s1408_s7, 4096, %s1412_s12, %s1417_s6, %s1625_s25, %s1625_s25, %s1624_s16  }
  0x62   : > { %255 = sbr.rel (%p1320_p12) target bundleno = 640 (0x280), region = 36  ;;  %p1626_p8 = scmp.eq.s32.totalorder (!%p1320_p12), %s1288_s24, 0 }
  0x69   : > { %1172 = dma.done.wait (%p1626_p8), [#allocation3], 128   ;;  %p1627_p11 = pmov %p1626_p8 }
  0x6a   : > { %p1628_p4 = pmov %p1626_p8 }
  0x6b   : > { %1174 = vsyncadd (%p1627_p11), [#allocation3], 4294967168 }
  0x6c   : > { %1176 = dma.done.wait (%p1628_p4), [#allocation6], 512   ;;  %p1629_p3 = pmov %p1628_p4 }
  0x6d   : > { %s265_s9 = sand.u32 1, %s1288_s24   ;;  %s1460_s6 = sand.u32 1, %s1197_s19  }
  0x6e   : > { %1178 = vsyncadd (%p1629_p3), [#allocation6], 4294966784  ;;  %s805_s30 = sshll.u32 %s1460_s6, 8  ;;  %s266_s7 = scalar_lea.sflag [#allocation3], %s265_s9 }
  0x6f   : > { %s1463_s12 = scalar_lea.vmem [#allocation7], %s805_s30  ;;  %p1630_p12 = scmp.ne.s32.totalorder %s1617_s27, 0 }
  0x71   : > { %1180 = dma.done.wait (%p1630_p12), %s266_s7, 4096  }
  0x72   : > { %1182 = vsyncadd (%p1630_p12), %s266_s7, 4294963200  ;;  %s806_s26 = sshll.u32 %s1460_s6, 5  ;;  %v1222_v0 = vmov 0   ;;  %v952_v1 = vld [vmem:[#allocation5 + $0x4] ss:$8 sps:$4 sm:$0xff]   ;;  %v958_v5 = vld [vmem:[#allocation2] sm:$0xff]   ;;  %v308_v6 = vlaneseq }
  0x73   : > { %379 = vmatprep.mubr.bf16.mxu0 %v1222_v0  ;;  %v954_v2 = vld [vmem:[#allocation5] ss:$8 sps:$4 sm:$0xff]   ;;  %347 = vmatprep.subr.bf16.mxu0 %v952_v1  ;;  %v955_v3 = vld [vmem:[#allocation5 + $0x14] ss:$8 sps:$4 sm:$0xff]   ;;  %v957_v4 = vld [vmem:[#allocation5 + $0x10] ss:$8 sps:$4 sm:$0xff]  }
  0x74   : > { %348 = vmatpush1.bf16.msra.mxu0 %v954_v2  ;;  %vm343_vm0 = vcmask 261120   ;;  %v309_v7 = vshrl.u32 %v308_v6, 7  ;;  %v306_v9 = vld [vmem:[%s1605_s2] sm:$0x3]  ;;  %s1477_s11 = scalar_lea.vmem [#allocation9], %s806_s26  ;;  %p813_p2 = scmp.ne.s32.totalorder %s1205_s21, 0 }
  0x75   : > { %349 = vmatprep.subr.bf16.mxu0 %v955_v3 }
  0x76   : > { %v310_v8 = vsub.s32 0, %v309_v7  ;;  %v314_v10 = vsub.s32 1, %v309_v7 }
  0x78   : > { %350 = vmatpush1.bf16.msra.mxu0 %v957_v4  ;;  %v311_v11 = vrot.slane %v306_v9, %v310_v8  ;;  %v315_v12 = vrot.slane %v306_v9, %v314_v10 }
  0x7b   : > { %812 = vmatmul.mubr.msk.bf16.vlgmr.msra.gmra.mrb[0].mxu0 %vm343_vm0, %v958_v5 }
 0x14c   : > { %393 = sbr.rel (%p813_p2) target bundleno = 341 (0x155), region = 52 }
 0x14e   : > { %v381_v13 = vpop.f32.mrb[0].mxu0 }
 0x14f   : > { %v1473_v14 = vadd.f32 %v381_v13, %v311_v11  ;;  %v383_v15 = vpop.f32.mrb[1].mxu0 }
 0x150   : > { %v384_v16 = vadd.f32 %v383_v15, %v315_v12  ;;  %v385_v17 = vpop.f32.mrb[2].mxu0 }
 0x151   : > { %v1475_v18 = vadd.f32 %v385_v17, %v311_v11  ;;  %v387_v19 = vpop.f32.mrb[3].mxu0  ;;  %394 = vst [vmem:[#allocation8] sm:$0xff] (!%p813_p2), %v1473_v14 }
 0x152   : > { %v388_v20 = vadd.f32 %v387_v19, %v315_v12  ;;  %395 = vst [vmem:[#allocation8 + $0x8] sm:$0xff] (!%p813_p2), %v384_v16 }
 0x153   : > { %396 = vst [vmem:[#allocation8 + $0x10] sm:$0xff] %v1475_v18 }
 0x154   : > { %397 = vst [vmem:[#allocation8 + $0x18] sm:$0xff] %v388_v20 }
 0x155 PF: > { %v959_v21 = vld [vmem:[%s1463_s12 + $0x4] ss:$8 sps:$4 sm:$0xff]   ;;  %v399_v22 = vpack.c.bf16 %v388_v20, %v384_v16  ;;  %v961_v23 = vld [vmem:[%s1463_s12] ss:$8 sps:$4 sm:$0xff]   ;;  %v962_v24 = vld [vmem:[%s1463_s12 + $0x14] ss:$8 sps:$4 sm:$0xff]   ;;  %v398_v54 = vpack.c.bf16 %v1475_v18, %v1473_v14 }
 0x156   : > { %592 = vmatprep.subr.bf16.mxu1 %v959_v21  ;;  %v964_v25 = vld [vmem:[%s1463_s12 + $0x10] ss:$8 sps:$4 sm:$0xff]   ;;  %v965_v26 = vld [vmem:[%s1463_s12 + $0x24] ss:$8 sps:$4 sm:$0xff]   ;;  %v967_v27 = vld [vmem:[%s1463_s12 + $0x20] ss:$8 sps:$4 sm:$0xff]  }
 0x157   : > { %624 = vmatprep.mubr.bf16.mxu1 %v399_v22  ;;  %593 = vmatpush1.bf16.msra.mxu1 %v961_v23  ;;  %v968_v28 = vld [vmem:[%s1463_s12 + $0x34] ss:$8 sps:$4 sm:$0xff]   ;;  %v970_v29 = vld [vmem:[%s1463_s12 + $0x30] ss:$8 sps:$4 sm:$0xff]   ;;  %v971_v30 = vld [vmem:[%s1463_s12 + $0x44] ss:$8 sps:$4 sm:$0xff]  }
 0x158   : > { %594 = vmatprep.subr.bf16.mxu1 %v962_v24  ;;  %v973_v31 = vld [vmem:[%s1463_s12 + $0x40] ss:$8 sps:$4 sm:$0xff]   ;;  %v974_v32 = vld [vmem:[%s1463_s12 + $0x54] ss:$8 sps:$4 sm:$0xff]   ;;  %v976_v33 = vld [vmem:[%s1463_s12 + $0x50] ss:$8 sps:$4 sm:$0xff]  }
 0x159   : > { %v977_v34 = vld [vmem:[%s1463_s12 + $0x64] ss:$8 sps:$4 sm:$0xff]   ;;  %v979_v35 = vld [vmem:[%s1463_s12 + $0x60] ss:$8 sps:$4 sm:$0xff]   ;;  %v980_v36 = vld [vmem:[%s1463_s12 + $0x74] ss:$8 sps:$4 sm:$0xff]  }
 0x15a   : > { %v982_v37 = vld [vmem:[%s1463_s12 + $0x70] ss:$8 sps:$4 sm:$0xff]   ;;  %v983_v38 = vld [vmem:[%s1463_s12 + $0x84] ss:$8 sps:$4 sm:$0xff]   ;;  %v985_v39 = vld [vmem:[%s1463_s12 + $0x80] ss:$8 sps:$4 sm:$0xff]  }
 0x15b   : > { %595 = vmatpush1.bf16.msra.mxu1 %v964_v25  ;;  %v986_v40 = vld [vmem:[%s1463_s12 + $0x94] ss:$8 sps:$4 sm:$0xff]   ;;  %v988_v41 = vld [vmem:[%s1463_s12 + $0x90] ss:$8 sps:$4 sm:$0xff]   ;;  %v989_v42 = vld [vmem:[%s1463_s12 + $0xa4] ss:$8 sps:$4 sm:$0xff]  }
 0x15c   : > { %596 = vmatprep.subr.bf16.mxu1 %v965_v26  ;;  %v991_v43 = vld [vmem:[%s1463_s12 + $0xa0] ss:$8 sps:$4 sm:$0xff]   ;;  %v992_v44 = vld [vmem:[%s1463_s12 + $0xb4] ss:$8 sps:$4 sm:$0xff]   ;;  %v994_v45 = vld [vmem:[%s1463_s12 + $0xb0] ss:$8 sps:$4 sm:$0xff]  }
 0x15d   : > { %v995_v46 = vld [vmem:[%s1463_s12 + $0xc4] ss:$8 sps:$4 sm:$0xff]   ;;  %v997_v47 = vld [vmem:[%s1463_s12 + $0xc0] ss:$8 sps:$4 sm:$0xff]   ;;  %v998_v48 = vld [vmem:[%s1463_s12 + $0xd4] ss:$8 sps:$4 sm:$0xff]  }
 0x15e   : > { %v1000_v49 = vld [vmem:[%s1463_s12 + $0xd0] ss:$8 sps:$4 sm:$0xff]   ;;  %v1001_v50 = vld [vmem:[%s1463_s12 + $0xe4] ss:$8 sps:$4 sm:$0xff]   ;;  %v1003_v51 = vld [vmem:[%s1463_s12 + $0xe0] ss:$8 sps:$4 sm:$0xff]  }
 0x15f   : > { %597 = vmatpush1.bf16.msra.mxu1 %v967_v27  ;;  %v1004_v52 = vld [vmem:[%s1463_s12 + $0xf4] ss:$8 sps:$4 sm:$0xff]   ;;  %v1006_v53 = vld [vmem:[%s1463_s12 + $0xf0] ss:$8 sps:$4 sm:$0xff]   ;;  %s1223_s13 = smov [#allocation8]   ;;  %p1631_p9 = scmp.eq.s32.totalorder %s1288_s24, 3 }
 0x160   : > { %598 = vmatprep.subr.bf16.mxu1 %v968_v28  ;;  %s654_s15 = sshll.u32 %s1223_s13, 4  ;;  %s655_s15 = int_to_ptr.vmem [resolvable:$true] %s654_s15 }
 0x161   : > { %s1093_s10 = scalar_lea.vmem %s655_s15, 512  ;;  %p1100_p10 = scmp.lt.s32.totalorder %s655_s15, %s655_s15 }
 0x162   : > { %p1094_p5 = scmp.ne.s32.totalorder %s655_s15, %s1093_s10  ;;  %p1101_p13 = scmp.lt.s32.totalorder %s1093_s10, %s1093_s10 }
 0x163   : > { %599 = vmatpush1.bf16.msra.mxu1 %v970_v29 }
 0x164   : > { %600 = vmatprep.subr.bf16.mxu1 %v971_v30  ;;  %p1095_p1 = pnand %p1094_p5, %p1631_p9  ;;  %p1102_p0 = por %p1101_p13, %p1100_p10 }
 0x166   : > { %p1096_p6 = pneg %p1095_p1 }
 0x167   : > { %601 = vmatpush1.bf16.msra.mxu1 %v973_v31 }
 0x168   : > { %602 = vmatprep.subr.bf16.mxu1 %v974_v32  ;;  %p1103_p7 = pnand %p1102_p0, %p1096_p6 }
 0x16b   : > { %603 = vmatpush1.bf16.msra.mxu1 %v976_v33 }
 0x16c   : > { %604 = vmatprep.subr.bf16.mxu1 %v977_v34 }
 0x16f   : > { %605 = vmatpush1.bf16.msra.mxu1 %v979_v35 }
 0x170   : > { %606 = vmatprep.subr.bf16.mxu1 %v980_v36 }
 0x173   : > { %607 = vmatpush1.bf16.msra.mxu1 %v982_v37 }
 0x174   : > { %608 = vmatprep.subr.bf16.mxu1 %v983_v38 }
 0x177   : > { %609 = vmatpush1.bf16.msra.mxu1 %v985_v39 }
 0x178   : > { %610 = vmatprep.subr.bf16.mxu1 %v986_v40 }
 0x17b   : > { %611 = vmatpush1.bf16.msra.mxu1 %v988_v41 }
 0x17c   : > { %612 = vmatprep.subr.bf16.mxu1 %v989_v42 }
 0x17f   : > { %613 = vmatpush1.bf16.msra.mxu1 %v991_v43 }
 0x180   : > { %614 = vmatprep.subr.bf16.mxu1 %v992_v44 }
 0x183   : > { %615 = vmatpush1.bf16.msra.mxu1 %v994_v45 }
 0x184   : > { %616 = vmatprep.subr.bf16.mxu1 %v995_v46 }
 0x187   : > { %617 = vmatpush1.bf16.msra.mxu1 %v997_v47 }
 0x188   : > { %618 = vmatprep.subr.bf16.mxu1 %v998_v48 }
 0x18b   : > { %619 = vmatpush1.bf16.msra.mxu1 %v1000_v49 }
 0x18c   : > { %620 = vmatprep.subr.bf16.mxu1 %v1001_v50 }
 0x18f   : > { %621 = vmatpush1.bf16.msra.mxu1 %v1003_v51 }
 0x190   : > { %622 = vmatprep.subr.bf16.mxu1 %v1004_v52 }
 0x193   : > { %623 = vmatpush1.bf16.msra.mxu1 %v1006_v53 }
 0x196   : > { %625 = vmatmul.mubr.bf16.vlgmr.msra.gmra.mrb[0].mxu1 %v398_v54 }
 0x197   : > { %1106 = shalt.err (!%p1103_p7)
}
 0x198   : > { %s1107_s25 = scalar_lea.hbm %s1607_s4, 512  ;;  %p1632_p11 = pmov %p1631_p9 }
 0x199   : > { %p1108_p8 = scmp.ne.s32.totalorder %s1607_s4, %s1107_s25  ;;  %p1113_p12 = scmp.lt.u32.totalorder %s1107_s25, %s1607_s4 }
 0x19b   : > { %p1109_p4 = pnand %p1108_p8, %p1632_p11 }
 0x19d   : > { %p1110_p3 = pneg %p1109_p4 }
 0x19f   : > { %p1115_p2 = pnand %p1113_p12, %p1110_p3 }
 0x1a1   : > { %1118 = shalt.err (!%p1115_p2)
}
 0x1a2   : > { %s1224_s26 = smov 256   ;;  %s1225_s27 = smov 16  }
 0x1a3   : > { %p1633_p5 = pmov %p1631_p9  ;;  %s854_s10 = sshll.u32 %s1205_s21, 9 }
 0x1a4   : > { %s673_s17 = sshll.u32 %s1477_s11, 4  ;;  %s1544_s9 = scalar_lea.hbm %s1608_s5, %s854_s10  ;;  %s1546_s17 = int_to_ptr.vmem [resolvable:$true] %s673_s17 }
 0x1a5   : > { %866 = dma.vmem_to_hbm [thread:$0]  (%p1633_p5), %s655_s15, 512, %s1607_s4, [#allocation4], %s1224_s26, %s1224_s26, %s1225_s27  }
 0x1a6   : > { %s640_s21 = scalar_lea.sflag [#allocation10], %s1460_s6  ;;  %s1119_s15 = scalar_lea.vmem %s1546_s17, 512 }
 0x1a7   : > { %p1120_p9 = scmp.ne.s32.totalorder %s1546_s17, %s1119_s15  ;;  %p1634_p1 = scmp.ne.s32.totalorder %s1618_s28, 0 }
 0x1a8   : > { %s1226_s30 = smov [#allocation9]  }
 0x1a9   : > { %p1121_p6 = pnand %p1120_p9, %p1634_p1  ;;  %s1123_s7 = sshll.u32 %s1226_s30, 4  ;;  %s1124_s7 = int_to_ptr.vmem [resolvable:$false] %s1123_s7 }
 0x1aa   : > { %s1125_s12 = scalar_lea.vmem %s1124_s7, 1024  ;;  %p1126_p13 = scmp.lt.s32.totalorder %s1546_s17, %s1124_s7 }
 0x1ab   : > { %p1122_p10 = pneg %p1121_p6  ;;  %p1127_p0 = scmp.lt.s32.totalorder %s1125_s12, %s1119_s15 }
 0x1ad   : > { %p1128_p7 = por %p1127_p0, %p1126_p13 }
 0x1af   : > { %p1129_p8 = pnand %p1128_p7, %p1122_p10 }
 0x269   : > { %v626_v55 = vpop.f32.mrb[0].mxu1 }
 0x26a   : > { %635 = vst [vmem:[%s1477_s11] sm:$0xff] %v626_v55  ;;  %v628_v56 = vpop.f32.mrb[1].mxu1 }
 0x26b   : > { %636 = vst [vmem:[%s1477_s11 + $0x8] sm:$0xff] %v628_v56  ;;  %v630_v57 = vpop.f32.mrb[2].mxu1 }
 0x26c   : > { %637 = vst [vmem:[%s1477_s11 + $0x10] sm:$0xff] %v630_v57  ;;  %v632_v58 = vpop.f32.mrb[3].mxu1 }
 0x26d   : > { %638 = vst [vmem:[%s1477_s11 + $0x18] sm:$0xff] %v632_v58 }
 0x26e   : > { %1132 = shalt.err (!%p1129_p8)
}
 0x26f   : > { %s1133_s11 = scalar_lea.hbm %s1544_s9, 512  ;;  %s1137_s10 = scalar_lea.hbm %s1608_s5, 2048 }
 0x270   : > { %p1134_p11 = scmp.ne.s32.totalorder %s1544_s9, %s1133_s11  ;;  %p1138_p12 = scmp.lt.u32.totalorder %s1544_s9, %s1608_s5 }
 0x271   : > { %p1139_p2 = scmp.lt.u32.totalorder %s1137_s10, %s1133_s11  ;;  %p1141_p9 = scmp.lt.u32.totalorder %s1133_s11, %s1544_s9 }
 0x272   : > { %p1135_p4 = pnand %p1134_p11, %p1634_p1 }
 0x273   : > { %p1140_p5 = por %p1139_p2, %p1138_p12 }
 0x274   : > { %p1136_p3 = pneg %p1135_p4 }
 0x275   : > { %p1142_p6 = por %p1141_p9, %p1140_p5 }
 0x277   : > { %p1143_p10 = pnand %p1142_p6, %p1136_p3 }
 0x279   : > { %1146 = shalt.err (!%p1143_p10)
}
 0x27a   : > { %867 = dma.vmem_to_hbm [thread:$0]  (%p1634_p1), %s1546_s17, 512, %s1544_s9, %s640_s21, %s1224_s26, %s1224_s26, %s1225_s27  }
 0x27b   : > { %p1635_p13 = scmp.eq.s32.totalorder %s1288_s24, 3 }
 0x27d   : > { %1184 = dma.done.wait (%p1635_p13), [#allocation4], 512   ;;  %p1636_p0 = pmov %p1635_p13 }
 0x27f   : > { %1186 = vsyncadd (%p1636_p0), [#allocation4], 4294966784 }
 0x280 PF: > { %s1637_s15 = sld [smem:[#allocation16_spill]]  ;;  %p893_p7 = scmp.ge.s32.totalorder %s1213_s23, 2 }
 0x281   : > { %s692_s28 = sand.u32 1, %s1193_s18  }
 0x282   : > { %s693_s30 = scalar_lea.sflag [#allocation10], %s692_s28 }
 0x286   : > { %p1638_p8 = scmp.ne.s32.totalorder %s1637_s15, 0 }
 0x288   : > { %p883_p11 = pnand %p893_p7, %p1638_p8 }
 0x28a   : > { %1188 = dma.done.wait (!%p883_p11), %s693_s30, 512  }
 0x28b   : > { %1190 = vsyncadd (!%p883_p11), %s693_s30, 4294966784  ;;  %s22_s23 = sadd.s32 1, %s1213_s23   ;;  %s1639_s18 = smov %s1197_s19 }
 0x28c   : > { %p19_p4 = scmp.ge.s32.totalorder %s22_s23, 6   ;;  %s1640_s19 = smov %s1201_s20 }
 0x28d   : > { %s1641_s20 = smov %s1415_s29  ;;  %s1642_s21 = smov %s1209_s22 }
 0x28e   : > { %s1643_s22 = smov %s1645_s14  ;;  %21 = sbr.rel (!%p19_p4) target bundleno = 7 (0x7), region = 103 }
 0x295   :  { %698 = vsyncpa [#allocation3], 1 }
 0x296   :  { %700 = vsyncpa [#allocation3 + $0x1], 1 }
 0x297   :  { %701 = vsyncpa [#allocation6], 1 }
 0x298   :  { %702 = vsyncpa [#allocation4], 1 }
 0x299   :  { %704 = vsyncpa [#allocation4 + $0x1], 1 }
 0x29a   :  { %705 = vsyncpa [#allocation10], 1 }
 0x29b   :  { %707 = vsyncpa [#allocation10 + $0x1], 1 }

</bundles_post_ra>
